<compile_context>
chip_gen: v5e
topology: v5e:2x2
jax: 0.10.0
libtpu: 0.0.40
codegen_flags: <defaults>
</compile_context>

<pallas_src>
import math

import jax
import jax.numpy as jnp
from jax.experimental import pallas as pl
from jax.experimental.pallas import tpu as pltpu

ATOM_FDIM = 133          # chemprop functional-group feature dim (the "133")
D_ATTN = 32              # w_q / w_k / w_v output dim
F_PAD = 256              # 133 padded to a lane-dense 256 (2 x 128 lanes)
QKV_PAD = 128            # 3*32 = 96 fused QKV lanes padded to 128
LN_EPS = 1e-6
NEG_BIG = -1e9           # matches masked_fill(mask == 0, -1000000000.0)
KEY_PAD_BIAS = -1e30     # additive bias that removes zero-padded key rows


def _round_up(x, m):
    return ((x + m - 1) // m) * m


def _bucket_rows(n):
    """Bucketed row padding so the Mosaic compile is reused across sizes."""
    r = max(8, _round_up(n, 8))
    if r <= 256:
        return pl.next_power_of_2(r)
    return _round_up(r, 256)


# ------------------------------ Pallas kernel -------------------------------
def _attention_layer_kernel(
    fg_ref, init_ref,
    wqkv_ref, bqkv_ref, wd_ref, bd_ref, gamma_ref, beta_ref,
    lmask_ref, kbias_ref,
    o_ref,
    q_scr, k_scr, v_scr, pm_scr,
):
    """One query-row tile of AttentionLayer.forward (all keys resident)."""
    tq = o_ref.shape[0]
    i = pl.program_id(0)
    row0 = pl.multiple_of(i * tq, tq)

    # --- step 0: fused full-slab QKV projection + padding mask, cached in
    #     VMEM scratch and reused by every query tile (grid is "arbitrary") ---
    @pl.when(i == 0)
    def _init():
        qkv = jnp.dot(fg_ref[...], wqkv_ref[...],
                      preferred_element_type=jnp.float32) + bqkv_ref[...]
        # fold 1/sqrt(d_k) into q once ([N,32] multiply, not [tq,N])
        q_scr[...] = qkv[:, 0:D_ATTN] * (1.0 / math.sqrt(D_ATTN))
        k_scr[...] = qkv[:, D_ATTN:2 * D_ATTN]
        v_scr[...] = qkv[:, 2 * D_ATTN:3 * D_ATTN]
        # bf16 indicator -> native bf16 MXU contraction for the mask matmul
        pm_scr[...] = (init_ref[...] != 0.0).astype(jnp.bfloat16)

    q = q_scr[pl.ds(row0, tq), :]          # [tq, 32]  (pre-scaled)
    k = k_scr[...]                         # [Np, 32]
    v = v_scr[...]                         # [Np, 32]
    pm_q = pm_scr[pl.ds(row0, tq), :]      # [tq, Fp] bf16
    pm_all = pm_scr[...]                   # [Np, Fp] bf16

    # --- padding mask: mask[a, b] = <1[init_q[a] != 0], 1[init_all[b] != 0]> ---
    mask = jax.lax.dot_general(pm_q, pm_all, (((1,), (1,)), ((), ())),
                               preferred_element_type=jnp.float32)       # [tq, Np]

    # --- scaled dot-product attention (masked_fill + padded-key bias fused) ---
    scores = jax.lax.dot_general(q, k, (((1,), (1,)), ((), ())),
                                 preferred_element_type=jnp.float32)     # [tq, Np]
    scores = jnp.where(mask == 0.0, NEG_BIG, scores) + kbias_ref[...]

    m = jnp.max(scores, axis=-1, keepdims=True)
    e = jnp.exp(scores - m)
    l = jnp.sum(e, axis=-1, keepdims=True)
    x = jnp.dot(e, v, preferred_element_type=jnp.float32)                # [tq, 32]
    x = x * pl.reciprocal(l, approx=False)   # deferred softmax normalization

    # --- output dense + residual ---
    h = jnp.dot(x, wd_ref[...], preferred_element_type=jnp.float32) + bd_ref[...]
    # TODO(synk): nn.Dropout(0.1) is the identity in eval(); training-mode dropout not lowered.
    z = h + fg_ref[pl.ds(row0, tq), :]                                   # [tq, Fp]

    # --- LayerNorm over the 133 real features ---
    # Padded lanes of z are exactly zero (zero-padded wd/bd/fg), so the sum is
    # already over real lanes; padded lanes only need masking before variance.
    mean = jnp.sum(z, axis=-1, keepdims=True) * (1.0 / ATOM_FDIM)
    centered = (z - mean) * lmask_ref[...]
    var = jnp.sum(centered * centered, axis=-1, keepdims=True) * (1.0 / ATOM_FDIM)
    inv = jax.lax.rsqrt(var + LN_EPS)
    # gamma/beta are zero in padded lanes, so padded output lanes are exactly 0.
    o_ref[...] = (centered * inv * gamma_ref[...] + beta_ref[...]).astype(o_ref.dtype)


# ------------------------------ wrapper --------------------------------------
def _pad2d(a, rows, cols):
    return jnp.zeros((rows, cols), a.dtype).at[: a.shape[0], : a.shape[1]].set(a)


def attention_layer_forward(params, fg_hiddens, init_hiddens, *, tq=256):
    """Pallas forward of chemprop AttentionLayer (inference)."""
    n, f = fg_hiddens.shape
    assert f == ATOM_FDIM and init_hiddens.shape == (n, f)

    n_pad = _bucket_rows(n)
    tq_eff = min(tq, n_pad)
    assert n_pad % tq_eff == 0
    grid = (n_pad // tq_eff,)

    # Lane-dense padding (133 -> 256) for unmasked vld/vst; zero-padded init
    # rows auto-mask padded keys, and the key-bias input removes them entirely.
    fg_p = _pad2d(fg_hiddens, n_pad, F_PAD)
    init_p = _pad2d(init_hiddens, n_pad, F_PAD)

    # Fused QKV weight/bias: lanes [0:32)=Q, [32:64)=K, [64:96)=V, [96:128)=0.
    wqkv = jnp.zeros((F_PAD, QKV_PAD), jnp.float32)
    wqkv = wqkv.at[:ATOM_FDIM, 0:D_ATTN].set(params["wq"])
    wqkv = wqkv.at[:ATOM_FDIM, D_ATTN:2 * D_ATTN].set(params["wk"])
    wqkv = wqkv.at[:ATOM_FDIM, 2 * D_ATTN:3 * D_ATTN].set(params["wv"])
    bqkv = jnp.zeros((1, QKV_PAD), jnp.float32)
    bqkv = bqkv.at[:, 0:D_ATTN].set(params["bq"])
    bqkv = bqkv.at[:, D_ATTN:2 * D_ATTN].set(params["bk"])
    bqkv = bqkv.at[:, 2 * D_ATTN:3 * D_ATTN].set(params["bv"])

    wd_p = _pad2d(params["wd"], D_ATTN, F_PAD)
    bd_p = _pad2d(params["bd"], 1, F_PAD)
    gamma_p = _pad2d(params["gamma"], 1, F_PAD)
    beta_p = _pad2d(params["beta"], 1, F_PAD)

    # Runtime data inputs (not baked into the compile): real-lane mask for
    # LayerNorm and an additive key bias excluding zero-padded key rows.
    lane_mask = (jnp.arange(F_PAD) < ATOM_FDIM).astype(jnp.float32).reshape(1, F_PAD)
    key_bias = jnp.where(jnp.arange(n_pad) < n, 0.0, KEY_PAD_BIAS)
    key_bias = key_bias.astype(jnp.float32).reshape(1, n_pad)

    resident = lambda i: (0, 0)  # weights + full fg/init stay resident across steps

    # Rough resident-VMEM estimate; raise the scoped limit only when needed.
    vmem_est = (
        4 * n_pad * F_PAD * 4          # fg + init (double-buffered)
        + 3 * n_pad * 128 * 4          # q/k/v scratch (lane-padded layout)
        + n_pad * F_PAD * 2            # bf16 padding-mask scratch
        + 6 * tq_eff * n_pad * 4       # mask/scores/exp temporaries
        + 2 * tq_eff * F_PAD * 4       # output tile (double-buffered)
        + (2 << 20)                    # weights, biases, headroom
    )
    cp_kwargs = dict(dimension_semantics=("arbitrary",))
    if vmem_est > (28 << 20):
        # TODO(synk): on v7x (64 MiB VMEM/TC) very large N needs a key-tiled
        # flash-style variant rather than raising the limit further.
        cp_kwargs["vmem_limit_bytes"] = min(int(1.25 * vmem_est), 96 << 20)

    out = pl.pallas_call(
        _attention_layer_kernel,
        out_shape=jax.ShapeDtypeStruct((n_pad, F_PAD), jnp.float32),
        grid_spec=pltpu.PrefetchScalarGridSpec(
            num_scalar_prefetch=0,
            grid=grid,
            in_specs=[
                pl.BlockSpec((n_pad, F_PAD), resident),     # fg  (all rows)
                pl.BlockSpec((n_pad, F_PAD), resident),     # init (all rows)
                pl.BlockSpec((F_PAD, QKV_PAD), resident),   # fused Wqkv
                pl.BlockSpec((1, QKV_PAD), resident),       # fused bqkv
                pl.BlockSpec((D_ATTN, F_PAD), resident),    # Wd
                pl.BlockSpec((1, F_PAD), resident),         # bd
                pl.BlockSpec((1, F_PAD), resident),         # LayerNorm gamma
                pl.BlockSpec((1, F_PAD), resident),         # LayerNorm beta
                pl.BlockSpec((1, F_PAD), resident),         # real-lane mask
                pl.BlockSpec((1, n_pad), resident),         # padded-key bias
            ],
            out_specs=pl.BlockSpec((tq_eff, F_PAD), lambda i: (i, 0)),
            scratch_shapes=[
                pltpu.VMEM((n_pad, D_ATTN), jnp.float32),   # q (pre-scaled)
                pltpu.VMEM((n_pad, D_ATTN), jnp.float32),   # k
                pltpu.VMEM((n_pad, D_ATTN), jnp.float32),   # v
                pltpu.VMEM((n_pad, F_PAD), jnp.bfloat16),   # padding mask
            ],
        ),
        compiler_params=pltpu.CompilerParams(**cp_kwargs),
    )(fg_p, init_p, wqkv, bqkv, wd_p, bd_p, gamma_p, beta_p, lane_mask, key_bias)

    # TODO(synk): for very large N the resident key/value slab and the [tq, N]
    # score tile exceed VMEM; that regime needs a key-tiled flash-style variant
    # (not needed for chemprop functional-group counts).
    return out[:n, :ATOM_FDIM]


# --------------------------- parameters & reference --------------------------
def _torch_linear_init(key, in_f, out_f):
    """nn.Linear-style init: U(-1/sqrt(in), 1/sqrt(in)); stored as [in, out]."""
    kw, kb = jax.random.split(key)
    bound = 1.0 / math.sqrt(in_f)
    w = jax.random.uniform(kw, (in_f, out_f), jnp.float32, -bound, bound)
    b = jax.random.uniform(kb, (1, out_f), jnp.float32, -bound, bound)
    return w, b


def make_params(key, hidden_size=32):
    kq, kk, kv, kd = jax.random.split(key, 4)
    p = {"hidden_size": hidden_size}  # stored by the torch module, unused in forward
    p["wq"], p["bq"] = _torch_linear_init(kq, ATOM_FDIM, D_ATTN)
    p["wk"], p["bk"] = _torch_linear_init(kk, ATOM_FDIM, D_ATTN)
    p["wv"], p["bv"] = _torch_linear_init(kv, ATOM_FDIM, D_ATTN)
    p["wd"], p["bd"] = _torch_linear_init(kd, D_ATTN, ATOM_FDIM)
    p["gamma"] = jnp.ones((1, ATOM_FDIM), jnp.float32)
    p["beta"] = jnp.zeros((1, ATOM_FDIM), jnp.float32)
    return p


def attention_layer_reference(params, fg, init):
    """Plain-JAX mirror of the PyTorch forward (eval mode)."""
    q = fg @ params["wq"] + params["bq"]
    k = fg @ params["wk"] + params["bk"]
    v = fg @ params["wv"] + params["bv"]
    pm = (init != 0.0).astype(jnp.float32)
    mask = pm @ pm.T
    scores = (q @ k.T) / math.sqrt(q.shape[-1])
    scores = jnp.where(mask == 0.0, NEG_BIG, scores)
    p_attn = jax.nn.softmax(scores, axis=-1)
    x = p_attn @ v
    h = x @ params["wd"] + params["bd"]
    z = h + fg
    mean = jnp.mean(z, axis=-1, keepdims=True)
    var = jnp.mean((z - mean) ** 2, axis=-1, keepdims=True)
    return (z - mean) * jax.lax.rsqrt(var + LN_EPS) * params["gamma"] + params["beta"]


# ---------------------------------- main --------------------------------------
if __name__ == "__main__":
    key = jax.random.PRNGKey(0)
    kp, kx, ki, km = jax.random.split(key, 4)
    params = make_params(kp)

    N = 20  # non-multiple-of-8 row count exercises the ragged/padded-key path
    fg_hiddens = jax.random.normal(kx, (N, ATOM_FDIM), jnp.float32)
    # init_hiddens with structural zeros so the padding mask is non-trivial,
    # including two fully-zero rows (fully masked queries/keys).
    init_hiddens = jax.random.normal(ki, (N, ATOM_FDIM), jnp.float32)
    keep = (jax.random.uniform(km, (N, ATOM_FDIM)) > 0.3).astype(jnp.float32)
    init_hiddens = (init_hiddens * keep).at[N - 2:].set(0.0)

    out = attention_layer_forward(params, fg_hiddens, init_hiddens)
    out = jax.block_until_ready(out)

    ref = attention_layer_reference(params, fg_hiddens, init_hiddens)
    assert out.shape == (N, ATOM_FDIM)
    assert jnp.allclose(out, ref, atol=1e-4, rtol=1e-4), float(jnp.max(jnp.abs(out - ref)))

    print("KERNEL_OK")
</pallas_src>

<mosaic_0001>
module attributes {stable_mosaic.version = 11 : i64} {
  func.func @_attention_layer_kernel(%arg0: i32, %arg1: memref<32x256xf32, #tpu.memory_space<vmem>>, %arg2: memref<32x256xf32, #tpu.memory_space<vmem>>, %arg3: memref<256x128xf32, #tpu.memory_space<vmem>>, %arg4: memref<1x128xf32, #tpu.memory_space<vmem>>, %arg5: memref<32x256xf32, #tpu.memory_space<vmem>>, %arg6: memref<1x256xf32, #tpu.memory_space<vmem>>, %arg7: memref<1x256xf32, #tpu.memory_space<vmem>>, %arg8: memref<1x256xf32, #tpu.memory_space<vmem>>, %arg9: memref<1x256xf32, #tpu.memory_space<vmem>>, %arg10: memref<1x32xf32, #tpu.memory_space<vmem>>, %arg11: memref<32x256xf32, #tpu.memory_space<vmem>>, %arg12: memref<32x32xf32, #tpu.memory_space<vmem>>, %arg13: memref<32x32xf32, #tpu.memory_space<vmem>>, %arg14: memref<32x32xf32, #tpu.memory_space<vmem>>, %arg15: memref<32x256xbf16, #tpu.memory_space<vmem>>) attributes {dimension_semantics = [#tpu.dimension_semantics<arbitrary>], iteration_bounds = array<i64: 1>, scalar_prefetch = 0 : i64, scratch_operands = 4 : i64, tpu.core_type = #tpu.core_type<tc>, window_params = [{pipeline_mode = #tpu.pipeline_mode<synchronous>, transform_indices = @transform_0, window_bounds = array<i64: 32, 256>}, {pipeline_mode = #tpu.pipeline_mode<synchronous>, transform_indices = @transform_1, window_bounds = array<i64: 32, 256>}, {pipeline_mode = #tpu.pipeline_mode<synchronous>, transform_indices = @transform_2, window_bounds = array<i64: 256, 128>}, {pipeline_mode = #tpu.pipeline_mode<synchronous>, transform_indices = @transform_3, window_bounds = array<i64: 1, 128>}, {pipeline_mode = #tpu.pipeline_mode<synchronous>, transform_indices = @transform_4, window_bounds = array<i64: 32, 256>}, {pipeline_mode = #tpu.pipeline_mode<synchronous>, transform_indices = @transform_5, window_bounds = array<i64: 1, 256>}, {pipeline_mode = #tpu.pipeline_mode<synchronous>, transform_indices = @transform_6, window_bounds = array<i64: 1, 256>}, {pipeline_mode = #tpu.pipeline_mode<synchronous>, transform_indices = @transform_7, window_bounds = array<i64: 1, 256>}, {pipeline_mode = #tpu.pipeline_mode<synchronous>, transform_indices = @transform_8, window_bounds = array<i64: 1, 256>}, {pipeline_mode = #tpu.pipeline_mode<synchronous>, transform_indices = @transform_9, window_bounds = array<i64: 1, 32>}, {transform_indices = @transform_10, window_bounds = array<i64: 32, 256>}]} {
    %c32_i32 = arith.constant 32 : i32
    %0 = arith.muli %arg0, %c32_i32 : i32
    %1 = tpu.assume_multiple %0, 32 : i32
    %c0_i32 = arith.constant 0 : i32
    %2 = arith.cmpi eq, %arg0, %c0_i32 : i32
    %3 = arith.extui %2 : i1 to i32
    %c0_i32_0 = arith.constant 0 : i32
    %4 = arith.cmpi ne, %3, %c0_i32_0 : i32
    scf.if %4 {
      %c0_35 = arith.constant 0 : index
      %c0_36 = arith.constant 0 : index
      %66 = vector.load %arg1[%c0_35, %c0_36] : memref<32x256xf32, #tpu.memory_space<vmem>>, vector<32x256xf32>
      %c0_37 = arith.constant 0 : index
      %c0_38 = arith.constant 0 : index
      %67 = vector.load %arg3[%c0_37, %c0_38] : memref<256x128xf32, #tpu.memory_space<vmem>>, vector<256x128xf32>
      %cst_39 = arith.constant dense<0.000000e+00> : vector<32x128xf32>
      %68 = tpu.matmul %66, %67, %cst_39 {dimension_numbers = #tpu.dot_dimension_numbers<[1], [0], [0], [1], [0, 0, 1, 1], [], []>} : vector<32x256xf32>, vector<256x128xf32>, vector<32x128xf32> -> vector<32x128xf32>
      %c0_40 = arith.constant 0 : index
      %c0_41 = arith.constant 0 : index
      %69 = vector.load %arg4[%c0_40, %c0_41] : memref<1x128xf32, #tpu.memory_space<vmem>>, vector<1x128xf32>
      %70 = vector.broadcast %69 : vector<1x128xf32> to vector<32x128xf32>
      %71 = arith.addf %68, %70 : vector<32x128xf32>
      %72 = vector.extract_strided_slice %71 {offsets = [0, 0], sizes = [32, 32], strides = [1, 1]} : vector<32x128xf32> to vector<32x32xf32>
      %cst_42 = arith.constant 0.176776692 : f32
      %73 = vector.broadcast %cst_42 : f32 to vector<32x32xf32>
      %74 = arith.mulf %72, %73 : vector<32x32xf32>
      %c0_43 = arith.constant 0 : index
      %c0_44 = arith.constant 0 : index
      %75 = vector.load %arg12[%c0_43, %c0_44] : memref<32x32xf32, #tpu.memory_space<vmem>>, vector<32x32xf32>
      tpu.vector_store %arg12[%c0_43, %c0_44], %74 {strides = array<i32>} : memref<32x32xf32, #tpu.memory_space<vmem>>, vector<32x32xf32>,
      %76 = vector.extract_strided_slice %71 {offsets = [0, 32], sizes = [32, 32], strides = [1, 1]} : vector<32x128xf32> to vector<32x32xf32>
      %c0_45 = arith.constant 0 : index
      %c0_46 = arith.constant 0 : index
      %77 = vector.load %arg13[%c0_45, %c0_46] : memref<32x32xf32, #tpu.memory_space<vmem>>, vector<32x32xf32>
      tpu.vector_store %arg13[%c0_45, %c0_46], %76 {strides = array<i32>} : memref<32x32xf32, #tpu.memory_space<vmem>>, vector<32x32xf32>,
      %78 = vector.extract_strided_slice %71 {offsets = [0, 64], sizes = [32, 32], strides = [1, 1]} : vector<32x128xf32> to vector<32x32xf32>
      %c0_47 = arith.constant 0 : index
      %c0_48 = arith.constant 0 : index
      %79 = vector.load %arg14[%c0_47, %c0_48] : memref<32x32xf32, #tpu.memory_space<vmem>>, vector<32x32xf32>
      tpu.vector_store %arg14[%c0_47, %c0_48], %78 {strides = array<i32>} : memref<32x32xf32, #tpu.memory_space<vmem>>, vector<32x32xf32>,
      %c0_49 = arith.constant 0 : index
      %c0_50 = arith.constant 0 : index
      %80 = vector.load %arg2[%c0_49, %c0_50] : memref<32x256xf32, #tpu.memory_space<vmem>>, vector<32x256xf32>
      %cst_51 = arith.constant 0.000000e+00 : f32
      %81 = vector.broadcast %cst_51 : f32 to vector<32x256xf32>
      %82 = arith.cmpf one, %80, %81 : vector<32x256xf32>
      %83 = arith.extui %82 : vector<32x256xi1> to vector<32x256xi32>
      %84 = arith.sitofp %83 : vector<32x256xi32> to vector<32x256xf32>
      %85 = arith.truncf %84 : vector<32x256xf32> to vector<32x256xbf16>
      %c0_52 = arith.constant 0 : index
      %c0_53 = arith.constant 0 : index
      %86 = vector.load %arg15[%c0_52, %c0_53] : memref<32x256xbf16, #tpu.memory_space<vmem>>, vector<32x256xbf16>
      tpu.vector_store %arg15[%c0_52, %c0_53], %85 {strides = array<i32>} : memref<32x256xbf16, #tpu.memory_space<vmem>>, vector<32x256xbf16>,
    } else {
    }
    %5 = arith.index_cast %1 : i32 to index
    %c0 = arith.constant 0 : index
    %6 = vector.load %arg12[%5, %c0] : memref<32x32xf32, #tpu.memory_space<vmem>>, vector<32x32xf32>
    %c0_1 = arith.constant 0 : index
    %c0_2 = arith.constant 0 : index
    %7 = vector.load %arg13[%c0_1, %c0_2] : memref<32x32xf32, #tpu.memory_space<vmem>>, vector<32x32xf32>
    %c0_3 = arith.constant 0 : index
    %c0_4 = arith.constant 0 : index
    %8 = vector.load %arg14[%c0_3, %c0_4] : memref<32x32xf32, #tpu.memory_space<vmem>>, vector<32x32xf32>
    %9 = arith.index_cast %1 : i32 to index
    %c0_5 = arith.constant 0 : index
    %10 = vector.load %arg15[%9, %c0_5] : memref<32x256xbf16, #tpu.memory_space<vmem>>, vector<32x256xbf16>
    %c0_6 = arith.constant 0 : index
    %c0_7 = arith.constant 0 : index
    %11 = vector.load %arg15[%c0_6, %c0_7] : memref<32x256xbf16, #tpu.memory_space<vmem>>, vector<32x256xbf16>
    %cst = arith.constant dense<0.000000e+00> : vector<32x32xf32>
    %12 = tpu.matmul %10, %11, %cst {dimension_numbers = #tpu.dot_dimension_numbers<[1], [1], [0], [0], [0, 0, 1, 0], [], []>} : vector<32x256xbf16>, vector<32x256xbf16>, vector<32x32xf32> -> vector<32x32xf32>
    %cst_8 = arith.constant dense<0.000000e+00> : vector<32x32xf32>
    %13 = tpu.matmul %6, %7, %cst_8 {dimension_numbers = #tpu.dot_dimension_numbers<[1], [1], [0], [0], [0, 0, 1, 0], [], []>} : vector<32x32xf32>, vector<32x32xf32>, vector<32x32xf32> -> vector<32x32xf32>
    %cst_9 = arith.constant 0.000000e+00 : f32
    %14 = vector.broadcast %cst_9 : f32 to vector<32x32xf32>
    %15 = arith.cmpf oeq, %12, %14 : vector<32x32xf32>
    %cst_10 = arith.constant -1.000000e+09 : f32
    %16 = vector.broadcast %cst_10 : f32 to vector<32x32xf32>
    %17 = arith.select %15, %16, %13 : vector<32x32xi1>, vector<32x32xf32>
    %c0_11 = arith.constant 0 : index
    %c0_12 = arith.constant 0 : index
    %18 = vector.load %arg10[%c0_11, %c0_12] : memref<1x32xf32, #tpu.memory_space<vmem>>, vector<1x32xf32>
    %19 = vector.broadcast %18 : vector<1x32xf32> to vector<32x32xf32>
    %20 = arith.addf %17, %19 : vector<32x32xf32>
    %cst_13 = arith.constant dense<0xFF800000> : vector<32xf32>
    %21 = vector.multi_reduction <maximumf>, %20, %cst_13 [1] : vector<32x32xf32> to vector<32xf32>
    %22 = vector.shape_cast %21 : vector<32xf32> to vector<32x1xf32>
    %23 = vector.broadcast %22 : vector<32x1xf32> to vector<32x32xf32>
    %24 = arith.subf %20, %23 : vector<32x32xf32>
    %25 = math.exp %24 : vector<32x32xf32>
    %cst_14 = arith.constant dense<0.000000e+00> : vector<32xf32>
    %26 = vector.multi_reduction <add>, %25, %cst_14 [1] : vector<32x32xf32> to vector<32xf32>
    %27 = vector.shape_cast %26 : vector<32xf32> to vector<32x1xf32>
    %cst_15 = arith.constant dense<0.000000e+00> : vector<32x32xf32>
    %28 = tpu.matmul %25, %8, %cst_15 {dimension_numbers = #tpu.dot_dimension_numbers<[1], [0], [0], [1], [0, 0, 1, 1], [], []>} : vector<32x32xf32>, vector<32x32xf32>, vector<32x32xf32> -> vector<32x32xf32>
    %29 = tpu.reciprocal %27 : vector<32x1xf32> -> vector<32x1xf32>
    %30 = vector.broadcast %29 : vector<32x1xf32> to vector<32x32xf32>
    %31 = arith.mulf %28, %30 : vector<32x32xf32>
    %c0_16 = arith.constant 0 : index
    %c0_17 = arith.constant 0 : index
    %32 = vector.load %arg5[%c0_16, %c0_17] : memref<32x256xf32, #tpu.memory_space<vmem>>, vector<32x256xf32>
    %cst_18 = arith.constant dense<0.000000e+00> : vector<32x256xf32>
    %33 = tpu.matmul %31, %32, %cst_18 {dimension_numbers = #tpu.dot_dimension_numbers<[1], [0], [0], [1], [0, 0, 1, 1], [], []>} : vector<32x32xf32>, vector<32x256xf32>, vector<32x256xf32> -> vector<32x256xf32>
    %c0_19 = arith.constant 0 : index
    %c0_20 = arith.constant 0 : index
    %34 = vector.load %arg6[%c0_19, %c0_20] : memref<1x256xf32, #tpu.memory_space<vmem>>, vector<1x256xf32>
    %35 = vector.broadcast %34 : vector<1x256xf32> to vector<32x256xf32>
    %36 = arith.addf %33, %35 : vector<32x256xf32>
    %37 = arith.index_cast %1 : i32 to index
    %c0_21 = arith.constant 0 : index
    %38 = vector.load %arg1[%37, %c0_21] : memref<32x256xf32, #tpu.memory_space<vmem>>, vector<32x256xf32>
    %39 = arith.addf %36, %38 : vector<32x256xf32>
    %cst_22 = arith.constant dense<0.000000e+00> : vector<32xf32>
    %40 = vector.multi_reduction <add>, %39, %cst_22 [1] : vector<32x256xf32> to vector<32xf32>
    %41 = vector.shape_cast %40 : vector<32xf32> to vector<32x1xf32>
    %cst_23 = arith.constant 0.00751879718 : f32
    %42 = vector.broadcast %cst_23 : f32 to vector<32x1xf32>
    %43 = arith.mulf %41, %42 : vector<32x1xf32>
    %44 = vector.broadcast %43 : vector<32x1xf32> to vector<32x256xf32>
    %45 = arith.subf %39, %44 : vector<32x256xf32>
    %c0_24 = arith.constant 0 : index
    %c0_25 = arith.constant 0 : index
    %46 = vector.load %arg9[%c0_24, %c0_25] : memref<1x256xf32, #tpu.memory_space<vmem>>, vector<1x256xf32>
    %47 = vector.broadcast %46 : vector<1x256xf32> to vector<32x256xf32>
    %48 = arith.mulf %45, %47 : vector<32x256xf32>
    %49 = arith.mulf %48, %48 : vector<32x256xf32>
    %cst_26 = arith.constant dense<0.000000e+00> : vector<32xf32>
    %50 = vector.multi_reduction <add>, %49, %cst_26 [1] : vector<32x256xf32> to vector<32xf32>
    %51 = vector.shape_cast %50 : vector<32xf32> to vector<32x1xf32>
    %cst_27 = arith.constant 0.00751879718 : f32
    %52 = vector.broadcast %cst_27 : f32 to vector<32x1xf32>
    %53 = arith.mulf %51, %52 : vector<32x1xf32>
    %cst_28 = arith.constant 9.99999997E-7 : f32
    %54 = vector.broadcast %cst_28 : f32 to vector<32x1xf32>
    %55 = arith.addf %53, %54 : vector<32x1xf32>
    %56 = math.rsqrt %55 : vector<32x1xf32>
    %57 = vector.broadcast %56 : vector<32x1xf32> to vector<32x256xf32>
    %58 = arith.mulf %48, %57 : vector<32x256xf32>
    %c0_29 = arith.constant 0 : index
    %c0_30 = arith.constant 0 : index
    %59 = vector.load %arg7[%c0_29, %c0_30] : memref<1x256xf32, #tpu.memory_space<vmem>>, vector<1x256xf32>
    %60 = vector.broadcast %59 : vector<1x256xf32> to vector<32x256xf32>
    %61 = arith.mulf %58, %60 : vector<32x256xf32>
    %c0_31 = arith.constant 0 : index
    %c0_32 = arith.constant 0 : index
    %62 = vector.load %arg8[%c0_31, %c0_32] : memref<1x256xf32, #tpu.memory_space<vmem>>, vector<1x256xf32>
    %63 = vector.broadcast %62 : vector<1x256xf32> to vector<32x256xf32>
    %64 = arith.addf %61, %63 : vector<32x256xf32>
    %c0_33 = arith.constant 0 : index
    %c0_34 = arith.constant 0 : index
    %65 = vector.load %arg11[%c0_33, %c0_34] : memref<32x256xf32, #tpu.memory_space<vmem>>, vector<32x256xf32>
    tpu.vector_store %arg11[%c0_33, %c0_34], %64 {strides = array<i32>} : memref<32x256xf32, #tpu.memory_space<vmem>>, vector<32x256xf32>,
    return
  }
  func.func @transform_0(%arg0: i32) -> (i32, i32) {
    %c0_i32 = arith.constant 0 : i32
    %c0_i32_0 = arith.constant 0 : i32
    %c0_i32_1 = arith.constant 0 : i32
    return %c0_i32, %c0_i32_0 : i32, i32
  }
  func.func @transform_1(%arg0: i32) -> (i32, i32) {
    %c0_i32 = arith.constant 0 : i32
    %c0_i32_0 = arith.constant 0 : i32
    %c0_i32_1 = arith.constant 0 : i32
    return %c0_i32, %c0_i32_0 : i32, i32
  }
  func.func @transform_2(%arg0: i32) -> (i32, i32) {
    %c0_i32 = arith.constant 0 : i32
    %c0_i32_0 = arith.constant 0 : i32
    %c0_i32_1 = arith.constant 0 : i32
    return %c0_i32, %c0_i32_0 : i32, i32
  }
  func.func @transform_3(%arg0: i32) -> (i32, i32) {
    %c0_i32 = arith.constant 0 : i32
    %c0_i32_0 = arith.constant 0 : i32
    %c0_i32_1 = arith.constant 0 : i32
    return %c0_i32, %c0_i32_0 : i32, i32
  }
  func.func @transform_4(%arg0: i32) -> (i32, i32) {
    %c0_i32 = arith.constant 0 : i32
    %c0_i32_0 = arith.constant 0 : i32
    %c0_i32_1 = arith.constant 0 : i32
    return %c0_i32, %c0_i32_0 : i32, i32
  }
  func.func @transform_5(%arg0: i32) -> (i32, i32) {
    %c0_i32 = arith.constant 0 : i32
    %c0_i32_0 = arith.constant 0 : i32
    %c0_i32_1 = arith.constant 0 : i32
    return %c0_i32, %c0_i32_0 : i32, i32
  }
  func.func @transform_6(%arg0: i32) -> (i32, i32) {
    %c0_i32 = arith.constant 0 : i32
    %c0_i32_0 = arith.constant 0 : i32
    %c0_i32_1 = arith.constant 0 : i32
    return %c0_i32, %c0_i32_0 : i32, i32
  }
  func.func @transform_7(%arg0: i32) -> (i32, i32) {
    %c0_i32 = arith.constant 0 : i32
    %c0_i32_0 = arith.constant 0 : i32
    %c0_i32_1 = arith.constant 0 : i32
    return %c0_i32, %c0_i32_0 : i32, i32
  }
  func.func @transform_8(%arg0: i32) -> (i32, i32) {
    %c0_i32 = arith.constant 0 : i32
    %c0_i32_0 = arith.constant 0 : i32
    %c0_i32_1 = arith.constant 0 : i32
    return %c0_i32, %c0_i32_0 : i32, i32
  }
  func.func @transform_9(%arg0: i32) -> (i32, i32) {
    %c0_i32 = arith.constant 0 : i32
    %c0_i32_0 = arith.constant 0 : i32
    %c0_i32_1 = arith.constant 0 : i32
    return %c0_i32, %c0_i32_0 : i32, i32
  }
  func.func @transform_10(%arg0: i32) -> (i32, i32) {
    %c0_i32 = arith.constant 0 : i32
    %c0_i32_0 = arith.constant 0 : i32
    return %arg0, %c0_i32 : i32, i32
  }
}

</mosaic_0001>

<bundles_post_ra>
// kernel: tpu_custom_call.1
= control target key start
LH: loop header
LB: loop body
LE: loop exit
PB: predicated region body
PF: predicated region fallthrough
CT: control target
= control target key end

     0   :  { %15 = vsyncpa [#allocation7], 0  ;;  %s1452_s0 = inlined_call_operand.hbm [shape: f32[32,256], index: 0, kind: input, shape index: {}]   ;;  %s1453_s1 = inlined_call_operand.hbm [shape: f32[32,256], index: 1, kind: input, shape index: {}]   ;;  %s1454_s2 = inlined_call_operand.hbm [shape: f32[256,128], index: 2, kind: input, shape index: {}]   ;;  %s1455_s3 = inlined_call_operand.hbm [shape: f32[1,128], index: 3, kind: input, shape index: {}]   ;;  %s1456_s4 = inlined_call_operand.hbm [shape: f32[32,256], index: 4, kind: input, shape index: {}]   ;;  %s1457_s5 = inlined_call_operand.vmem [shape: f32[1,256], index: 5, kind: input, shape index: {}]   ;;  %s1458_s6 = inlined_call_operand.vmem [shape: f32[1,256], index: 6, kind: input, shape index: {}]   ;;  %s1459_s7 = inlined_call_operand.vmem [shape: f32[1,256], index: 7, kind: input, shape index: {}]   ;;  %s1460_s8 = inlined_call_operand.hbm [shape: f32[1,256], index: 8, kind: input, shape index: {}]   ;;  %s1461_s9 = inlined_call_operand.vmem [shape: f32[1,32], index: 9, kind: input, shape index: {}]   ;;  %s1462_s10 = inlined_call_operand.hbm [shape: f32[32,256], index: 10, kind: output, shape index: {}]  }
   0x1   :  { %16 = vsyncpa [#allocation10], 0 }
   0x2   :  { %17 = vsyncpa [#allocation13], 0 }
   0x3   :  { %18 = vsyncpa [#allocation16], 0 }
   0x4   :  { %19 = vsyncpa [#allocation8], 0  ;;  %s37_s15 = sshll.u32 %s1453_s1, 4  ;;  %s1202_s16 = smov [#allocation9]   ;;  %s38_s15 = int_to_ptr.hbm [resolvable:$true] %s37_s15 }
   0x5   :  { %s39_s17 = sshll.u32 %s1202_s16, 4  ;;  %s64_s20 = sshll.u32 %s1455_s3, 4  ;;  %s40_s17 = int_to_ptr.vmem [resolvable:$true] %s39_s17  ;;  %s65_s20 = int_to_ptr.hbm [resolvable:$true] %s64_s20 }
   0x6   :  { %s1203_s21 = smov 256   ;;  %s1204_s22 = smov 16  }
   0x7   :  { %45 = dma.hbm_to_vmem [thread:$0]  %s38_s15, 1024, %s40_s17, [#allocation10], %s1203_s21, %s1203_s21, %s1204_s22  }
   0x8   :  { %s1205_s23 = smov [#allocation12]   ;;  %s24_s1 = sshll.u32 %s1452_s0, 4  ;;  %s25_s1 = int_to_ptr.hbm [resolvable:$true] %s24_s1 }
   0x9   :  { %s66_s24 = sshll.u32 %s1205_s23, 4  ;;  %s50_s3 = sshll.u32 %s1454_s2, 4  ;;  %s67_s24 = int_to_ptr.vmem [resolvable:$true] %s66_s24  ;;  %s51_s3 = int_to_ptr.hbm [resolvable:$true] %s50_s3 }
   0xa   :  { %69 = dma.hbm_to_vmem [thread:$0]  %s65_s20, 16, %s67_s24, [#allocation13]  }
   0xb   :  { %s1206_s29 = smov [#allocation6]   ;;  %s1207_s11 = smov [#allocation11]  }
   0xc   :  { %s26_s30 = sshll.u32 %s1206_s29, 4  ;;  %s52_s12 = sshll.u32 %s1207_s11, 4  ;;  %s27_s30 = int_to_ptr.vmem [resolvable:$true] %s26_s30  ;;  %s53_s12 = int_to_ptr.vmem [resolvable:$true] %s52_s12 }
   0xd   :  { %32 = dma.hbm_to_vmem [thread:$0]  %s25_s1, 1024, %s27_s30, [#allocation7], %s1203_s21, %s1203_s21, %s1204_s22  }
   0xe   :  { %s1208_s13 = smov 128   ;;  %s1209_s0 = smov 8  }
   0xf   :  { %58 = dma.hbm_to_vmem [thread:$0]  %s51_s3, 4096, %s53_s12, [#allocation10], %s1208_s13, %s1208_s13, %s1209_s0  }
  0x10   :  { %s74_s16 = sshll.u32 %s1456_s4, 4  ;;  %s1210_s2 = smov [#allocation14]   ;;  %s75_s16 = int_to_ptr.hbm [resolvable:$true] %s74_s16 }
  0x11   :  { %s76_s17 = sshll.u32 %s1210_s2, 4  ;;  %s94_s20 = sshll.u32 %s1460_s8, 4  ;;  %s77_s17 = int_to_ptr.vmem [resolvable:$true] %s76_s17  ;;  %s95_s20 = int_to_ptr.hbm [resolvable:$true] %s94_s20 }
  0x12   :  { %82 = dma.hbm_to_vmem [thread:$0]  %s75_s16, 1024, %s77_s17, [#allocation13], %s1203_s21, %s1203_s21, %s1204_s22  }
  0x13   :  { %s1211_s23 = smov [#allocation15]  }
  0x14   :  { %s96_s24 = sshll.u32 %s1211_s23, 4  ;;  %s97_s24 = int_to_ptr.vmem [resolvable:$true] %s96_s24 }
  0x15   :  { %99 = dma.hbm_to_vmem [thread:$0]  %s95_s20, 32, %s97_s24, [#allocation16]  }
  0x16   :  { %1192 = dma.done.wait [#allocation7], 1024  }
  0x17   :  { %1193 = vsyncadd [#allocation7], 4294966272 }
  0x18   :  { %1194 = dma.done.wait [#allocation10], 5120  }
  0x19   :  { %1195 = vsyncadd [#allocation10], 4294962176 }
  0x1a   :  { %1196 = dma.done.wait [#allocation13], 1040  }
  0x1b   :  { %1197 = vsyncadd [#allocation13], 4294966256 }
  0x1c   :  { %1198 = dma.done.wait [#allocation16], 32  }
  0x1d   :  { %1199 = vsyncadd [#allocation16], 4294967264  ;;  %v155_v0 = vld [vmem:[#allocation11 + $0x78] sm:$0xff]  ;;  %v154_v1 = vld [vmem:[#allocation11 + $0x70] sm:$0xff]  ;;  %vm238_vm0 = vcmask 261120   ;;  %s1212_s4 = smov 96  }
  0x1e   :  { %v171_v2 = vld [vmem:[#allocation11 + $0xf8] sm:$0xff]  ;;  %176 = vmatpush.msra.mxu0 %v155_v0  ;;  %v170_v3 = vld [vmem:[#allocation11 + $0xf0] sm:$0xff]  ;;  %v153_v4 = vld [vmem:[#allocation11 + $0x68] sm:$0xff]  ;;  %s1213_s8 = smov 64   ;;  %s888_s11 = sshll.u32 %s1462_s10, 4  ;;  %s889_s11 = int_to_ptr.hbm [resolvable:$true] %s888_s11 }
  0x1f   :  { %205 = vmatpush.msra.mxu1 %v171_v2  ;;  %v169_v5 = vld [vmem:[#allocation11 + $0xe8] sm:$0xff]  ;;  %v152_v6 = vld [vmem:[#allocation11 + $0x60] sm:$0xff]  ;;  %v151_v8 = vld [vmem:[#allocation11 + $0x58] sm:$0xff] }
  0x20   :  { %177 = vmatpush.msra.mxu0 %v154_v1  ;;  %v168_v7 = vld [vmem:[#allocation11 + $0xe0] sm:$0xff]  ;;  %v167_v9 = vld [vmem:[#allocation11 + $0xd8] sm:$0xff]  ;;  %v150_v10 = vld [vmem:[#allocation11 + $0x50] sm:$0xff]  ;;  %v1214_v1 = vmov 0.0  }
  0x21   :  { %206 = vmatpush.msra.mxu1 %v170_v3  ;;  %v166_v11 = vld [vmem:[#allocation11 + $0xd0] sm:$0xff]  ;;  %v149_v12 = vld [vmem:[#allocation11 + $0x48] sm:$0xff]  ;;  %v148_v14 = vld [vmem:[#allocation11 + $0x40] sm:$0xff] }
  0x22   :  { %178 = vmatpush.msra.mxu0 %v153_v4  ;;  %v165_v13 = vld [vmem:[#allocation11 + $0xc8] sm:$0xff]  ;;  %v164_v15 = vld [vmem:[#allocation11 + $0xc0] sm:$0xff]  ;;  %v147_v16 = vld [vmem:[#allocation11 + $0x38] sm:$0xff] }
  0x23   :  { %207 = vmatpush.msra.mxu1 %v169_v5  ;;  %v163_v17 = vld [vmem:[#allocation11 + $0xb8] sm:$0xff]  ;;  %v146_v18 = vld [vmem:[#allocation11 + $0x30] sm:$0xff]  ;;  %v145_v20 = vld [vmem:[#allocation11 + $0x28] sm:$0xff] }
  0x24   :  { %179 = vmatpush.msra.mxu0 %v152_v6  ;;  %v162_v19 = vld [vmem:[#allocation11 + $0xb0] sm:$0xff]  ;;  %v161_v21 = vld [vmem:[#allocation11 + $0xa8] sm:$0xff]  ;;  %v144_v22 = vld [vmem:[#allocation11 + $0x20] sm:$0xff] }
  0x25   :  { %208 = vmatpush.msra.mxu1 %v168_v7  ;;  %v160_v23 = vld [vmem:[#allocation11 + $0xa0] sm:$0xff]  ;;  %v143_v24 = vld [vmem:[#allocation11 + $0x18] sm:$0xff]  ;;  %v142_v26 = vld [vmem:[#allocation11 + $0x10] sm:$0xff] }
  0x26   :  { %180 = vmatpush.msra.mxu0 %v151_v8  ;;  %v159_v25 = vld [vmem:[#allocation11 + $0x98] sm:$0xff]  ;;  %v158_v27 = vld [vmem:[#allocation11 + $0x90] sm:$0xff]  ;;  %v141_v28 = vld [vmem:[#allocation11 + $0x8] sm:$0xff] }
  0x27   :  { %209 = vmatpush.msra.mxu1 %v167_v9  ;;  %v157_v29 = vld [vmem:[#allocation11 + $0x88] sm:$0xff]  ;;  %v140_v30 = vld [vmem:[#allocation11] sm:$0xff]  ;;  %v1304_v34 = vld [vmem:[#allocation6 + $0x10] sm:$0xff] }
  0x28   :  { %181 = vmatpush.msra.mxu0 %v150_v10  ;;  %v156_v31 = vld [vmem:[#allocation11 + $0x80] sm:$0xff]  ;;  %v1300_v33 = vld [vmem:[#allocation6 + $0x8] sm:$0xff]  ;;  %v1306_v35 = vld [vmem:[#allocation6 + $0x18] sm:$0xff] }
  0x29   :  { %210 = vmatpush.msra.mxu1 %v166_v11  ;;  %v1298_v32 = vld [vmem:[#allocation6] sm:$0xff]  ;;  %v1312_v37 = vld [vmem:[#allocation6 + $0x28] sm:$0xff]  ;;  %v1316_v38 = vld [vmem:[#allocation6 + $0x30] sm:$0xff] }
  0x2a   :  { %182 = vmatpush.msra.mxu0 %v149_v12  ;;  %v1310_v36 = vld [vmem:[#allocation6 + $0x20] sm:$0xff]  ;;  %v1318_v39 = vld [vmem:[#allocation6 + $0x38] sm:$0xff]  ;;  %v284_v62 = vld [vmem:[#allocation9 + $0x28] sm:$0xff] }
  0x2b   :  { %211 = vmatpush.msra.mxu1 %v165_v13  ;;  %v998_v40 = vld [vmem:[#allocation12] ss:$0 sm:$0xff]  ;;  %v285_v63 = vld [vmem:[#allocation9 + $0x30] sm:$0xff]  ;;  %v286_v0 = vld [vmem:[#allocation9 + $0x38] sm:$0xff]  ;;  %vm292_vm2 = vcmp.ne.f32.partialorder %v284_v62, 0.0 }
  0x2c   :  { %183 = vmatpush.msra.mxu0 %v148_v14  ;;  %v283_v61 = vld [vmem:[#allocation9 + $0x20] sm:$0xff]  ;;  %vm293_vm3 = vcmp.ne.f32.partialorder %v285_v63, 0.0  ;;  %vm294_vm4 = vcmp.ne.f32.partialorder %v286_v0, 0.0  ;;  %v913_v3 = vsel %vm292_vm2, 1.0, %v1214_v1  ;;  %v280_v9 = vld [vmem:[#allocation9 + $0x8] sm:$0xff]  ;;  %v281_v10 = vld [vmem:[#allocation9 + $0x10] sm:$0xff] }
  0x2d   :  { %212 = vmatpush.msra.mxu1 %v164_v15  ;;  %vm291_vm1 = vcmp.ne.f32.partialorder %v283_v61, 0.0  ;;  %v914_v4 = vsel %vm293_vm3, 1.0, %v1214_v1  ;;  %v915_v5 = vsel %vm294_vm4, 1.0, %v1214_v1  ;;  %v279_v8 = vld [vmem:[#allocation9] sm:$0xff]  ;;  %v282_v11 = vld [vmem:[#allocation9 + $0x18] sm:$0xff]  ;;  %vm288_vm6 = vcmp.ne.f32.partialorder %v280_v9, 0.0 }
  0x2e   :  { %184 = vmatpush.msra.mxu0 %v147_v16  ;;  %v912_v2 = vsel %vm291_vm1, 1.0, %v1214_v1  ;;  %v314_v7 = vpack.c.bf16 %v915_v5, %v914_v4  ;;  %vm287_vm5 = vcmp.ne.f32.partialorder %v279_v8, 0.0  ;;  %vm289_vm7 = vcmp.ne.f32.partialorder %v281_v10, 0.0 }
  0x2f   :  { %213 = vmatpush.msra.mxu1 %v163_v17  ;;  %v313_v6 = vpack.c.bf16 %v913_v3, %v912_v2  ;;  %vm290_vm8 = vcmp.ne.f32.partialorder %v282_v11, 0.0  ;;  %v908_v12 = vsel %vm287_vm5, 1.0, %v1214_v1  ;;  %v909_v13 = vsel %vm288_vm6, 1.0, %v1214_v1 }
  0x30   :  { %185 = vmatpush.msra.mxu0 %v146_v18  ;;  %318 = vst [vmem:[#allocation5 + $0x18] sm:$0xff] %v314_v7  ;;  %v910_v14 = vsel %vm289_vm7, 1.0, %v1214_v1  ;;  %v911_v15 = vsel %vm290_vm8, 1.0, %v1214_v1  ;;  %v311_v16 = vpack.c.bf16 %v909_v13, %v908_v12  ;;  %v999_v13 = vld [vmem:[%s1461_s9] ss:$0 sm:$0xff] }
  0x31   :  { %214 = vmatpush.msra.mxu1 %v162_v19  ;;  %317 = vst [vmem:[#allocation5 + $0x10] sm:$0xff] %v313_v6  ;;  %v312_v19 = vpack.c.bf16 %v911_v15, %v910_v14 }
  0x32   :  { %186 = vmatpush.msra.mxu0 %v145_v20  ;;  %315 = vst [vmem:[#allocation5] sm:$0xff] %v311_v16 }
  0x33   :  { %215 = vmatpush.msra.mxu1 %v161_v21  ;;  %316 = vst [vmem:[#allocation5 + $0x8] sm:$0xff] %v312_v19 }
  0x34   :  { %187 = vmatpush.msra.mxu0 %v144_v22 }
  0x35   :  { %216 = vmatpush.msra.mxu1 %v160_v23 }
  0x36   :  { %188 = vmatpush.msra.mxu0 %v143_v24 }
  0x37   :  { %217 = vmatpush.msra.mxu1 %v159_v25  ;;  %v944_v20 = vld [vmem:[#allocation5 + $0x18] sm:$0xf0]  ;;  %v975_v21 = vld [vmem:[#allocation5 + $0x14] sm:$0xf0] }
  0x38   :  { %189 = vmatpush.msra.mxu0 %v142_v26  ;;  %v974_v17 = vld [vmem:[#allocation5 + $0x14] sm:$0xf]  ;;  %v942_v18 = vld [vmem:[#allocation5 + $0x10] sm:$0xf] }
  0x39   :  { %218 = vmatpush.msra.mxu1 %v158_v27  ;;  %v947_v22 = vor.u32 %v974_v17, %v944_v20  ;;  %v943_v23 = vor.u32 %v975_v21, %v942_v18  ;;  %v972_v24 = vld [vmem:[#allocation5 + $0x4] sm:$0xf]  ;;  %v934_v25 = vld [vmem:[#allocation5] sm:$0xf] }
  0x3a   :  { %190 = vmatpush.msra.mxu0 %v141_v28  ;;  %v936_v26 = vld [vmem:[#allocation5 + $0x8] sm:$0xf0]  ;;  %v973_v27 = vld [vmem:[#allocation5 + $0x4] sm:$0xf0] }
  0x3b   :  { %219 = vmatpush.msra.mxu1 %v157_v29  ;;  %410 = vmatpush.bf16.xpose.msra.mxu3 %v947_v22  ;;  %v939_v28 = vor.u32 %v972_v24, %v936_v26  ;;  %v935_v29 = vor.u32 %v973_v27, %v934_v25 }
  0x3c   :  { %191 = vmatpush.msra.mxu0 %v140_v30  ;;  %391 = vmatpush.bf16.xpose.msra.mxu2 %v943_v23  ;;  %v918_v30 = vld [vmem:[#allocation5] sm:$0xf] }
  0x3d   :  { %220 = vmatpush.msra.mxu1 %v156_v31  ;;  %192 = vmatmul.f32.vlgmr.msra.gmra.mxu0 %v1298_v32  ;;  %v969_v31 = vld [vmem:[#allocation5 + $0x4] sm:$0xf0] }
  0x3e   :  { %221 = vmatmul.f32.vlgmr.msra.gmra.mxu1 %v1300_v33 }
  0x43   :  { %411 = vmatpush.bf16.xpose.msra.mxu3 %v939_v28 }
  0x44   :  { %392 = vmatpush.bf16.xpose.msra.mxu2 %v935_v29 }
  0x45   :  { %195 = vmatmul.f32.gmra.mxu0 %v1304_v34 }
  0x46   :  { %224 = vmatmul.f32.gmra.mxu1 %v1306_v35 }
  0x4d   :  { %198 = vmatmul.f32.gmra.mxu0 %v1310_v36 }
  0x4e   :  { %227 = vmatmul.f32.gmra.mxu1 %v1312_v37 }
  0x55   :  { %201 = vmatmul.f32.gmra.mxu0 %v1316_v38 }
  0x56   :  { %230 = vmatmul.f32.gmra.mxu1 %v1318_v39 }
  0xba   :  { %v193_v41 = vpop.f32.mrf.mxu0 }
  0xbb   :  { %v222_v42 = vpop.f32.mrf.mxu1  ;;  %v194_v43 = vadd.f32 %v998_v40, %v193_v41  ;;  %v919_v41 = vor.u32 %v969_v31, %v918_v30 }
  0xbd   :  { %v223_v44 = vadd.f32 %v222_v42, %v194_v43  ;;  %v920_v42 = vld [vmem:[#allocation5 + $0x8] sm:$0xf0]  ;;  %393 = vmatmul.bf16.vlgmr.msra.gmra.mxu2 %v919_v41 }
  0xbf   :  { %v234_v45 = vmul.f32 0.17677669, %v223_v44 }
  0xc1   :  { %239 = vst.msk [vmem:[#allocation2] sm:$0xff] %vm238_vm0, %v234_v45  ;;  %v926_v45 = vld [vmem:[#allocation5 + $0x10] sm:$0xf] }
  0xc2   :  { %v196_v46 = vpop.f32.mrf.mxu0 }
  0xc3   :  { %v225_v47 = vpop.f32.mrf.mxu1  ;;  %v197_v48 = vadd.f32 %v998_v40, %v196_v46  ;;  %v971_v46 = vld [vmem:[#allocation5 + $0x14] sm:$0xf0] }
  0xc5   :  { %v226_v49 = vadd.f32 %v225_v47, %v197_v48  ;;  %v970_v47 = vld [vmem:[#allocation5 + $0x14] sm:$0xf]  ;;  %v927_v48 = vor.u32 %v971_v46, %v926_v45 }
  0xc7   :  { %v235_v50 = vmul.f32 0.17677669, %v226_v49  ;;  %249 = vrot.lane.b32.xlu1 %v226_v49, %s1212_s4 }
  0xc8   :  { %v320_v2 = vld [vmem:[#allocation2] sm:$0xff] }
  0xc9   :  { %240 = vst.msk [vmem:[#allocation2 + $0x8] sm:$0xff] %vm238_vm0, %v235_v50 }
  0xca   :  { %v199_v51 = vpop.f32.mrf.mxu0 }
  0xcb   :  { %v228_v52 = vpop.f32.mrf.mxu1  ;;  %v200_v53 = vadd.f32 %v998_v40, %v199_v51 }
  0xcd   :  { %v229_v54 = vadd.f32 %v228_v52, %v200_v53  ;;  %398 = vmatmul.bf16.gmra.mxu2 %v927_v48 }
  0xcf   :  { %v236_v55 = vmul.f32 0.17677669, %v229_v54  ;;  %267 = vrot.lane.b32.xlu2 %v229_v54, %s1213_s8  ;;  %247 = vrot.lane.b32.xlu1 %v223_v44, %s1212_s4 }
  0xd0   :  { %v321_v3 = vld [vmem:[#allocation2 + $0x8] sm:$0xff] }
  0xd1   :  { %241 = vst.msk [vmem:[#allocation2 + $0x10] sm:$0xff] %vm238_vm0, %v236_v55 }
  0xd2   :  { %v202_v56 = vpop.f32.mrf.mxu0 }
  0xd3   :  { %v231_v57 = vpop.f32.mrf.mxu1  ;;  %v203_v58 = vadd.f32 %v998_v40, %v202_v56  ;;  %v968_v40 = vld [vmem:[#allocation5 + $0x4] sm:$0xf] }
  0xd4   :  { %v923_v43 = vor.u32 %v968_v40, %v920_v42 }
  0xd5   :  { %v232_v59 = vadd.f32 %v231_v57, %v203_v58 }
  0xd6   :  { %412 = vmatmul.bf16.vlgmr.msra.gmra.mxu3 %v923_v43 }
  0xd7   :  { %v237_v60 = vmul.f32 0.17677669, %v232_v59  ;;  %253 = vrot.lane.b32.xlu0 %v232_v59, %s1212_s4  ;;  %269 = vrot.lane.b32.xlu2 %v232_v59, %s1213_s8 }
  0xd8   :  { %265 = vrot.lane.b32.xlu1 %v226_v49, %s1213_s8  ;;  %v928_v49 = vld [vmem:[#allocation5 + $0x18] sm:$0xf0]  ;;  %v322_v4 = vld [vmem:[#allocation2 + $0x10] sm:$0xff] }
  0xd9   :  { %242 = vst.msk [vmem:[#allocation2 + $0x18] sm:$0xff] %vm238_vm0, %v237_v60  ;;  %v931_v50 = vor.u32 %v970_v47, %v928_v49 }
  0xdf   :  { %251 = vrot.lane.b32.xlu0 %v229_v54, %s1212_s4  ;;  %263 = vrot.lane.b32.xlu2 %v223_v44, %s1213_s8 }
  0xe0   :  { %v323_v5 = vld [vmem:[#allocation2 + $0x18] sm:$0xff] }
  0xe6   :  { %417 = vmatmul.bf16.gmra.mxu3 %v931_v50 }
 0x129   :  { %v268_v44 = vpop.permute.xlu2 %267 }
 0x12a   :  { %277 = vst.msk [vmem:[#allocation4 + $0x10] sm:$0xff] %vm238_vm0, %v268_v44 }
 0x131   :  { %v270_v51 = vpop.permute.xlu2 %269  ;;  %v330_v55 = vld [vmem:[#allocation4 + $0x10] sm:$0xff] }
 0x132   :  { %278 = vst.msk [vmem:[#allocation4 + $0x18] sm:$0xff] %vm238_vm0, %v270_v51 }
 0x139   :  { %v250_v52 = vpop.permute.xlu1 %249  ;;  %v264_v53 = vpop.permute.xlu2 %263  ;;  %v331_v54 = vld [vmem:[#allocation4 + $0x18] sm:$0xff] }
 0x13a   :  { %260 = vst.msk [vmem:[#allocation3 + $0x8] sm:$0xff] %vm238_vm0, %v250_v52  ;;  %553 = vmatpush.msrb.mxu3 %v331_v54 }
 0x13b   :  { %275 = vst.msk [vmem:[#allocation4] sm:$0xff] %vm238_vm0, %v264_v53 }
 0x13c   :  { %554 = vmatpush.msrb.mxu3 %v330_v55 }
 0x140   :  { %v394_v6 = vpop.f32.mrf.mxu2 }
 0x141   :  { %v248_v56 = vpop.permute.xlu1 %247  ;;  %v325_v0 = vld [vmem:[#allocation3 + $0x8] sm:$0xff] }
 0x142   :  { %259 = vst.msk [vmem:[#allocation3] sm:$0xff] %vm238_vm0, %v248_v56  ;;  %v328_v62 = vld [vmem:[#allocation4] sm:$0xff] }
 0x148   :  { %v396_v7 = vpop.f32.mrf.mxu2 }
 0x149   :  { %v254_v57 = vpop.permute.xlu0 %253  ;;  %v324_v1 = vld [vmem:[#allocation3] sm:$0xff] }
 0x14a   :  { %262 = vst.msk [vmem:[#allocation3 + $0x18] sm:$0xff] %vm238_vm0, %v254_v57  ;;  %v266_v58 = vpop.permute.xlu1 %265 }
 0x14b   :  { %276 = vst.msk [vmem:[#allocation4 + $0x8] sm:$0xff] %vm238_vm0, %v266_v58 }
 0x150   :  { %v399_v8 = vpop.f32.mrf.mxu2 }
 0x151   :  { %v252_v59 = vpop.permute.xlu0 %251  ;;  %v327_v60 = vld [vmem:[#allocation3 + $0x18] sm:$0xff] }
 0x152   :  { %261 = vst.msk [vmem:[#allocation3 + $0x10] sm:$0xff] %vm238_vm0, %v252_v59  ;;  %948 = vmatpush.xpose.msk.msrb.mxu2 %vm238_vm0, %v327_v60  ;;  %v329_v61 = vld [vmem:[#allocation4 + $0x8] sm:$0xff] }
 0x153   :  { %555 = vmatpush.msrb.mxu3 %v329_v61 }
 0x155   :  { %556 = vmatpush.msrb.mxu3 %v328_v62 }
 0x158   :  { %v401_v10 = vpop.f32.mrf.mxu2 }
 0x159   :  { %v326_v63 = vld [vmem:[#allocation3 + $0x10] sm:$0xff]  ;;  %v413_v9 = vpop.f32.mrf.mxu3 }
 0x15a   :  { %949 = vmatpush.xpose.msk.msrb.mxu2 %vm238_vm0, %v326_v63  ;;  %v414_v11 = vadd.f32 %v413_v9, %v394_v6  ;;  %v636_v63 = vld [vmem:[#allocation14 + $0x30] sm:$0xff]  ;;  %v631_v6 = vld [vmem:[#allocation14 + $0x8] sm:$0xff] }
 0x15b   :  { %668 = vmatpush.msrb.mxu0 %v636_v63 }
 0x15c   :  { %vm477_vm9 = vcmp.eq.f32.partialorder %v414_v11, 0.0 }
 0x15e   :  { %950 = vmatpush.xpose.msk.msrb.mxu2 %vm238_vm0, %v325_v0  ;;  %v637_v0 = vld [vmem:[#allocation14 + $0x38] sm:$0xff] }
 0x15f   :  { %697 = vmatpush.msrb.mxu1 %v637_v0  ;;  %980 = vmatpush.msra.mxu3 %v637_v0 }
 0x161   :  { %v415_v12 = vpop.f32.mrf.mxu3 }
 0x162   :  { %951 = vmatpush.xpose.msk.msrb.mxu2 %vm238_vm0, %v324_v1  ;;  %v416_v17 = vadd.f32 %v415_v12, %v396_v7  ;;  %v634_v1 = vld [vmem:[#allocation14 + $0x20] sm:$0xff] }
 0x163   :  { %669 = vmatpush.msrb.mxu0 %v634_v1 }
 0x164   :  { %vm478_vm10 = vcmp.eq.f32.partialorder %v416_v17, 0.0 }
 0x165   :  { %952 = vmatmul.msk.f32.vlgmr.msrb.gmra.mxu2 %vm238_vm0, %v320_v2  ;;  %v635_v2 = vld [vmem:[#allocation14 + $0x28] sm:$0xff] }
 0x166   :  { %976 = vmatpush.msra.mxu2 %v636_v63  ;;  %698 = vmatpush.msrb.mxu1 %v635_v2 }
 0x167   :  { %981 = vmatpush.msra.mxu3 %v635_v2 }
 0x168   :  { %977 = vmatpush.msra.mxu2 %v634_v1 }
 0x169   :  { %v418_v19 = vpop.f32.mrf.mxu3 }
 0x16a   :  { %v419_v23 = vadd.f32 %v418_v19, %v399_v8 }
 0x16c   :  { %vm479_vm11 = vcmp.eq.f32.partialorder %v419_v23, 0.0 }
 0x16d   :  { %953 = vmatmul.msk.f32.gmra.mxu2 %vm238_vm0, %v321_v3  ;;  %v632_v3 = vld [vmem:[#allocation14 + $0x10] sm:$0xff] }
 0x16e   :  { %670 = vmatpush.msrb.mxu0 %v632_v3  ;;  %978 = vmatpush.msra.mxu2 %v632_v3  ;;  %v638_v3 = vld [vmem:[%s1457_s5] sm:$0x3] }
 0x171   :  { %v420_v26 = vpop.f32.mrf.mxu3 }
 0x172   :  { %v421_v29 = vadd.f32 %v420_v26, %v401_v10 }
 0x174   :  { %vm480_vm12 = vcmp.eq.f32.partialorder %v421_v29, 0.0 }
 0x175   :  { %954 = vmatmul.msk.f32.gmra.mxu2 %vm238_vm0, %v322_v4  ;;  %v633_v4 = vld [vmem:[#allocation14 + $0x18] sm:$0xff] }
 0x176   :  { %699 = vmatpush.msrb.mxu1 %v633_v4  ;;  %982 = vmatpush.msra.mxu3 %v633_v4  ;;  %v640_v4 = vperm.slane %v638_v3, 0 }
 0x178   :  { %700 = vmatpush.msrb.mxu1 %v631_v6  ;;  %983 = vmatpush.msra.mxu3 %v631_v6 }
 0x17d   :  { %955 = vmatmul.msk.f32.gmra.mxu2 %vm238_vm0, %v323_v5  ;;  %v630_v5 = vld [vmem:[#allocation14] sm:$0xff] }
 0x17e   :  { %671 = vmatpush.msrb.mxu0 %v630_v5  ;;  %979 = vmatpush.msra.mxu2 %v630_v5  ;;  %v641_v5 = vperm.slane %v638_v3, 1 }
 0x1e8   :  { %v465_v14 = vpop.f32.mrf.mxu2 }
 0x1e9   :  { %v481_v15 = vsel %vm477_vm9, -1e+09, %v465_v14 }
 0x1ea   :  { %v489_v16 = vadd.f32 %v999_v13, %v481_v15 }
 0x1ec   :  { %v493_v18 = vsel %vm238_vm0, %v489_v16, -inf }
 0x1ed   :  { %494 = vmax.xlane.f32.xlu0 %v493_v18 }
 0x1f0   :  { %v468_v20 = vpop.f32.mrf.mxu2 }
 0x1f1   :  { %v482_v21 = vsel %vm478_vm10, -1e+09, %v468_v20 }
 0x1f2   :  { %v490_v22 = vadd.f32 %v999_v13, %v482_v21 }
 0x1f4   :  { %v496_v24 = vsel %vm238_vm0, %v490_v22, -inf }
 0x1f5   :  { %497 = vmax.xlane.f32.xlu1 %v496_v24 }
 0x1f8   :  { %v471_v25 = vpop.f32.mrf.mxu2 }
 0x1f9   :  { %v483_v27 = vsel %vm479_vm11, -1e+09, %v471_v25 }
 0x1fa   :  { %v491_v28 = vadd.f32 %v999_v13, %v483_v27 }
 0x1fc   :  { %v499_v30 = vsel %vm238_vm0, %v491_v28, -inf }
 0x1fd   :  { %500 = vmax.xlane.f32.xlu2 %v499_v30 }
 0x200   :  { %v474_v31 = vpop.f32.mrf.mxu2 }
 0x201   :  { %v484_v40 = vsel %vm480_vm12, -1e+09, %v474_v31 }
 0x202   :  { %v492_v41 = vadd.f32 %v999_v13, %v484_v40 }
 0x204   :  { %v502_v42 = vsel %vm238_vm0, %v492_v41, -inf }
 0x205   :  { %503 = vmax.xlane.f32.xlu0 %v502_v42 }
 0x260   :  { %v495_v43 = vpop.xlane.xlu0 %494 }
 0x261   :  { %v505_v44 = vsub.f32 %v489_v16, %v495_v43 }
 0x263   :  { %v509_v45 = vmul.f32 1.442695, %v505_v44 }
 0x265   :  { %1000 = vpow2.f32 %v509_v45 }
 0x268   :  { %v498_v46 = vpop.xlane.xlu1 %497 }
 0x269   :  { %v506_v47 = vsub.f32 %v490_v22, %v498_v46 }
 0x26b   :  { %v1001_v48 = vpop.eup %1000  ;;  %v511_v49 = vmul.f32 1.442695, %v506_v47 }
 0x26c   :  { %956 = vmatmul.msk.f32.vlgmr.msrb.gmra.mxu3 %vm238_vm0, %v1001_v48  ;;  %v517_v50 = vsel %vm238_vm0, %v1001_v48, 0.0 }
 0x26d   :  { %1002 = vpow2.f32 %v511_v49  ;;  %518 = vadd.xlane.f32.xlu2 %v517_v50 }
 0x270   :  { %v501_v51 = vpop.xlane.xlu2 %500 }
 0x271   :  { %v507_v52 = vsub.f32 %v491_v28, %v501_v51 }
 0x273   :  { %v1003_v53 = vpop.eup %1002  ;;  %v513_v54 = vmul.f32 1.442695, %v507_v52 }
 0x274   :  { %957 = vmatmul.msk.f32.gmra.mxu3 %vm238_vm0, %v1003_v53  ;;  %v520_v55 = vsel %vm238_vm0, %v1003_v53, 0.0 }
 0x275   :  { %1004 = vpow2.f32 %v513_v54  ;;  %521 = vadd.xlane.f32.xlu0 %v520_v55 }
 0x278   :  { %v504_v56 = vpop.xlane.xlu0 %503 }
 0x279   :  { %v508_v57 = vsub.f32 %v492_v41, %v504_v56 }
 0x27b   :  { %v1005_v58 = vpop.eup %1004  ;;  %v515_v59 = vmul.f32 1.442695, %v508_v57 }
 0x27c   :  { %958 = vmatmul.msk.f32.gmra.mxu3 %vm238_vm0, %v1005_v58  ;;  %v523_v60 = vsel %vm238_vm0, %v1005_v58, 0.0 }
 0x27d   :  { %1006 = vpow2.f32 %v515_v59  ;;  %524 = vadd.xlane.f32.xlu2 %v523_v60 }
 0x283   :  { %v1007_v61 = vpop.eup %1006 }
 0x284   :  { %959 = vmatmul.msk.f32.gmra.mxu3 %vm238_vm0, %v1007_v61  ;;  %v526_v62 = vsel %vm238_vm0, %v1007_v61, 0.0 }
 0x285   :  { %527 = vadd.xlane.f32.xlu1 %v526_v62 }
 0x2e0   :  { %v519_v7 = vpop.xlane.xlu2 %518 }
 0x2e1   :  { %1008 = vrcp.f32 %v519_v7  ;;  %v581_v12 = vand.u32 2147483648, %v519_v7  ;;  %v579_v14 = vand.u32 2147483647, %v519_v7  ;;  %vm575_vm14 = vweird.f32 %v519_v7 }
 0x2e3   :  { %v582_v18 = vor.u32 1.1754944e-38, %v581_v12  ;;  %vm580_vm1 = vcmp.eq.f32.partialorder %v579_v14, 8.507059e+37 }
 0x2e7   :  { %v1009_v8 = vpop.eup %1008 }
 0x2e8   :  { %v571_v9 = vmul.f32 %v1009_v8, %v519_v7  ;;  %v522_v10 = vpop.xlane.xlu0 %521  ;;  %vm576_vm13 = vweird.f32 %v1009_v8 }
 0x2e9   :  { %1010 = vrcp.f32 %v522_v10  ;;  %vm577_vm15 = vmor %vm575_vm14, %vm576_vm13  ;;  %v595_v25 = vand.u32 2147483648, %v522_v10  ;;  %v593_v27 = vand.u32 2147483647, %v522_v10  ;;  %vm589_vm3 = vweird.f32 %v522_v10 }
 0x2ea   :  { %v572_v11 = vsub.f32 1.0, %v571_v9 }
 0x2eb   :  { %v596_v31 = vor.u32 1.1754944e-38, %v595_v25  ;;  %vm594_vm5 = vcmp.eq.f32.partialorder %v593_v27, 8.507059e+37 }
 0x2ec   :  { %v573_v13 = vmul.f32 %v1009_v8, %v572_v11 }
 0x2ee   :  { %v574_v15 = vadd.f32 %v1009_v8, %v573_v13 }
 0x2ef   :  { %v1011_v16 = vpop.eup %1010  ;;  %v558_v17 = vpop.f32.mrf.mxu3 }
 0x2f0   :  { %v585_v19 = vmul.f32 %v1011_v16, %v522_v10  ;;  %v578_v20 = vsel %vm577_vm15, %v1009_v8, %v574_v15  ;;  %v525_v21 = vpop.xlane.xlu2 %524  ;;  %vm590_vm2 = vweird.f32 %v1011_v16 }
 0x2f1   :  { %v583_v22 = vsel %vm580_vm1, %v582_v18, %v578_v20  ;;  %1012 = vrcp.f32 %v525_v21  ;;  %vm591_vm4 = vmor %vm589_vm3, %vm590_vm2  ;;  %v609_v46 = vand.u32 2147483648, %v525_v21  ;;  %v607_v48 = vand.u32 2147483647, %v525_v21 }
 0x2f2   :  { %v586_v23 = vsub.f32 1.0, %v585_v19  ;;  %v626_v24 = vmul.f32 %v583_v22, %v558_v17  ;;  %vm603_vm7 = vweird.f32 %v525_v21 }
 0x2f3   :  { %v610_v52 = vor.u32 1.1754944e-38, %v609_v46  ;;  %vm608_vm9 = vcmp.eq.f32.partialorder %v607_v48, 8.507059e+37 }
 0x2f4   :  { %960 = vmatmul.msk.f32.vlgmr.msrb.gmra.mxu0 %vm238_vm0, %v626_v24  ;;  %964 = vmatmul.msk.f32.vlgmr.msrb.gmra.mxu1 %vm238_vm0, %v626_v24  ;;  %v587_v26 = vmul.f32 %v1011_v16, %v586_v23 }
 0x2f6   :  { %v588_v28 = vadd.f32 %v1011_v16, %v587_v26 }
 0x2f7   :  { %v1013_v29 = vpop.eup %1012  ;;  %v561_v30 = vpop.f32.mrf.mxu3 }
 0x2f8   :  { %v599_v40 = vmul.f32 %v1013_v29, %v525_v21  ;;  %v592_v41 = vsel %vm591_vm4, %v1011_v16, %v588_v28  ;;  %v528_v42 = vpop.xlane.xlu1 %527  ;;  %vm604_vm6 = vweird.f32 %v1013_v29 }
 0x2f9   :  { %v597_v43 = vsel %vm594_vm5, %v596_v31, %v592_v41  ;;  %1014 = vrcp.f32 %v528_v42  ;;  %vm605_vm8 = vmor %vm603_vm7, %vm604_vm6  ;;  %v623_v58 = vand.u32 2147483648, %v528_v42  ;;  %v621_v60 = vand.u32 2147483647, %v528_v42 }
 0x2fa   :  { %v600_v44 = vsub.f32 1.0, %v599_v40  ;;  %v627_v45 = vmul.f32 %v597_v43, %v561_v30  ;;  %vm617_vm11 = vweird.f32 %v528_v42  ;;  %v756_v30 = vld [vmem:[#allocation15] sm:$0x3] }
 0x2fb   :  { %v624_v62 = vor.u32 1.1754944e-38, %v623_v58  ;;  %vm622_vm13 = vcmp.eq.f32.partialorder %v621_v60, 8.507059e+37  ;;  %v758_v40 = vperm.slane %v756_v30, 0  ;;  %v759_v41 = vperm.slane %v756_v30, 1 }
 0x2fc   :  { %961 = vmatmul.msk.f32.gmra.mxu0 %vm238_vm0, %v627_v45  ;;  %965 = vmatmul.msk.f32.gmra.mxu1 %vm238_vm0, %v627_v45  ;;  %v601_v47 = vmul.f32 %v1013_v29, %v600_v44 }
 0x2fe   :  { %v602_v49 = vadd.f32 %v1013_v29, %v601_v47 }
 0x2ff   :  { %v1015_v50 = vpop.eup %1014  ;;  %v564_v51 = vpop.f32.mrf.mxu3 }
 0x300   :  { %v613_v53 = vmul.f32 %v1015_v50, %v528_v42  ;;  %v606_v54 = vsel %vm605_vm8, %v1013_v29, %v602_v49  ;;  %vm618_vm10 = vweird.f32 %v1015_v50 }
 0x301   :  { %v611_v55 = vsel %vm608_vm9, %v610_v52, %v606_v54  ;;  %vm619_vm12 = vmor %vm617_vm11, %vm618_vm10 }
 0x302   :  { %v614_v56 = vsub.f32 1.0, %v613_v53  ;;  %v628_v57 = vmul.f32 %v611_v55, %v564_v51 }
 0x304   :  { %962 = vmatmul.msk.f32.gmra.mxu0 %vm238_vm0, %v628_v57  ;;  %966 = vmatmul.msk.f32.gmra.mxu1 %vm238_vm0, %v628_v57  ;;  %v615_v59 = vmul.f32 %v1015_v50, %v614_v56 }
 0x306   :  { %v616_v61 = vadd.f32 %v1015_v50, %v615_v59 }
 0x307   :  { %v567_v0 = vpop.f32.mrf.mxu3 }
 0x308   :  { %v620_v63 = vsel %vm619_vm12, %v1015_v50, %v616_v61 }
 0x309   :  { %v625_v1 = vsel %vm622_vm13, %v624_v62, %v620_v63 }
 0x30a   :  { %v629_v2 = vmul.f32 %v625_v1, %v567_v0 }
 0x30c   :  { %963 = vmatmul.msk.f32.vlgmr.msra.gmra.mxu2 %vm238_vm0, %v629_v2  ;;  %967 = vmatmul.msk.f32.vlgmr.msra.gmra.mxu3 %vm238_vm0, %v629_v2 }
 0x371   :  { %v673_v6 = vpop.f32.mrf.mxu0  ;;  %v702_v7 = vpop.f32.mrf.mxu1 }
 0x372   :  { %v674_v8 = vadd.f32 %v673_v6, %v640_v4  ;;  %v703_v9 = vadd.f32 %v702_v7, %v641_v5 }
 0x374   :  { %v724_v10 = vadd.f32 %v674_v8, %v1298_v32  ;;  %v725_v11 = vadd.f32 %v703_v9, %v1300_v33 }
 0x376   :  { %v732_v12 = vadd.f32 %v725_v11, %v724_v10 }
 0x378   :  { %733 = vadd.xlane.f32.xlu0 %v732_v12 }
 0x379   :  { %v676_v13 = vpop.f32.mrf.mxu0  ;;  %v705_v14 = vpop.f32.mrf.mxu1 }
 0x37a   :  { %v677_v15 = vadd.f32 %v676_v13, %v640_v4  ;;  %v706_v16 = vadd.f32 %v705_v14, %v641_v5 }
 0x37c   :  { %v726_v17 = vadd.f32 %v677_v15, %v1304_v34  ;;  %v727_v18 = vadd.f32 %v706_v16, %v1306_v35 }
 0x37e   :  { %v735_v19 = vadd.f32 %v727_v18, %v726_v17 }
 0x380   :  { %736 = vadd.xlane.f32.xlu1 %v735_v19 }
 0x381   :  { %v679_v20 = vpop.f32.mrf.mxu0  ;;  %v708_v21 = vpop.f32.mrf.mxu1 }
 0x382   :  { %v680_v22 = vadd.f32 %v679_v20, %v640_v4  ;;  %v709_v23 = vadd.f32 %v708_v21, %v641_v5  ;;  %v846_v21 = vld [vmem:[%s1458_s6] sm:$0x3]  ;;  %s1215_s6 = smov [#allocation17]  }
 0x384   :  { %v728_v32 = vadd.f32 %v680_v22, %v1310_v36  ;;  %v729_v33 = vadd.f32 %v709_v23, %v1312_v37 }
 0x386   :  { %v738_v24 = vadd.f32 %v729_v33, %v728_v32 }
 0x388   :  { %739 = vadd.xlane.f32.xlu2 %v738_v24 }
 0x38f   :  { %v682_v25 = vpop.f32.mrf.mxu2  ;;  %v711_v26 = vpop.f32.mrf.mxu3 }
 0x390   :  { %v683_v27 = vadd.f32 %v682_v25, %v640_v4  ;;  %v712_v28 = vadd.f32 %v711_v26, %v641_v5  ;;  %v1414_v26 = vperm.slane %v846_v21, 0 }
 0x392   :  { %v730_v34 = vadd.f32 %v683_v27, %v1316_v38  ;;  %v731_v35 = vadd.f32 %v712_v28, %v1318_v39  ;;  %v1416_v27 = vperm.slane %v846_v21, 1 }
 0x394   :  { %v741_v29 = vadd.f32 %v731_v35, %v730_v34 }
 0x396   :  { %742 = vadd.xlane.f32.xlu0 %v741_v29 }
 0x3eb   :  { %v734_v31 = vpop.xlane.xlu0 %733 }
 0x3ec   :  { %v744_v42 = vmul.f32 0.007518797, %v734_v31 }
 0x3ee   :  { %v748_v36 = vsub.f32 %v724_v10, %v744_v42  ;;  %v749_v43 = vsub.f32 %v725_v11, %v744_v42 }
 0x3f0   :  { %v1376_v37 = vmul.f32 %v758_v40, %v748_v36  ;;  %v1378_v44 = vmul.f32 %v759_v41, %v749_v43 }
 0x3f2   :  { %v770_v45 = vmul.f32 %v1376_v37, %v1376_v37  ;;  %v771_v38 = vmul.f32 %v1378_v44, %v1378_v44 }
 0x3f3   :  { %v737_v39 = vpop.xlane.xlu1 %736 }
 0x3f4   :  { %v745_v46 = vmul.f32 0.007518797, %v737_v39  ;;  %v778_v47 = vadd.f32 %v771_v38, %v770_v45 }
 0x3f6   :  { %v750_v48 = vsub.f32 %v726_v17, %v745_v46  ;;  %v751_v49 = vsub.f32 %v727_v18, %v745_v46  ;;  %779 = vadd.xlane.f32.xlu1 %v778_v47 }
 0x3f8   :  { %v1384_v50 = vmul.f32 %v758_v40, %v750_v48  ;;  %v1386_v51 = vmul.f32 %v759_v41, %v751_v49 }
 0x3fa   :  { %v772_v52 = vmul.f32 %v1384_v50, %v1384_v50  ;;  %v773_v53 = vmul.f32 %v1386_v51, %v1386_v51 }
 0x3fb   :  { %v740_v54 = vpop.xlane.xlu2 %739 }
 0x3fc   :  { %v746_v55 = vmul.f32 0.007518797, %v740_v54  ;;  %v781_v56 = vadd.f32 %v773_v53, %v772_v52 }
 0x3fe   :  { %v752_v57 = vsub.f32 %v728_v32, %v746_v55  ;;  %v753_v58 = vsub.f32 %v729_v33, %v746_v55  ;;  %782 = vadd.xlane.f32.xlu2 %v781_v56  ;;  %v860_v33 = vld [vmem:[%s1459_s7] sm:$0x3]  ;;  %s886_s7 = sshll.u32 %s1215_s6, 4  ;;  %s887_s7 = int_to_ptr.vmem [resolvable:$true] %s886_s7 }
 0x3ff   :  { %v1420_v29 = vperm.slane %v860_v33, 1 }
 0x400   :  { %v1392_v59 = vmul.f32 %v758_v40, %v752_v57  ;;  %v1394_v60 = vmul.f32 %v759_v41, %v753_v58 }
 0x402   :  { %v774_v61 = vmul.f32 %v1392_v59, %v1392_v59  ;;  %v775_v62 = vmul.f32 %v1394_v60, %v1394_v60 }
 0x404   :  { %v784_v63 = vadd.f32 %v775_v62, %v774_v61 }
 0x406   :  { %785 = vadd.xlane.f32.xlu0 %v784_v63 }
 0x409   :  { %v743_v0 = vpop.xlane.xlu0 %742 }
 0x40a   :  { %v747_v1 = vmul.f32 0.007518797, %v743_v0 }
 0x40c   :  { %v754_v2 = vsub.f32 %v730_v34, %v747_v1  ;;  %v755_v3 = vsub.f32 %v731_v35, %v747_v1  ;;  %v1418_v35 = vperm.slane %v860_v33, 0 }
 0x40e   :  { %v1400_v4 = vmul.f32 %v758_v40, %v754_v2  ;;  %v1402_v5 = vmul.f32 %v759_v41, %v755_v3 }
 0x410   :  { %v776_v6 = vmul.f32 %v1400_v4, %v1400_v4  ;;  %v777_v7 = vmul.f32 %v1402_v5, %v1402_v5 }
 0x412   :  { %v787_v8 = vadd.f32 %v777_v7, %v776_v6 }
 0x414   :  { %788 = vadd.xlane.f32.xlu1 %v787_v8 }
 0x469   :  { %v780_v9 = vpop.xlane.xlu1 %779 }
 0x46a   :  { %v790_v10 = vmul.f32 0.007518797, %v780_v9 }
 0x46c   :  { %v794_v11 = vadd.f32 1e-06, %v790_v10 }
 0x46e   :  { %1016 = vrsqrt.f32 %v794_v11  ;;  %vm804_vm14 = vweird.f32 %v794_v11 }
 0x471   :  { %v783_v12 = vpop.xlane.xlu2 %782 }
 0x472   :  { %v791_v13 = vmul.f32 0.007518797, %v783_v12 }
 0x474   :  { %v1017_v14 = vpop.eup %1016  ;;  %v795_v15 = vadd.f32 1e-06, %v791_v13 }
 0x475   :  { %v799_v16 = vmul.f32 %v1017_v14, %v794_v11  ;;  %vm805_vm0 = vweird.f32 %v1017_v14 }
 0x476   :  { %1018 = vrsqrt.f32 %v795_v15  ;;  %vm806_vm15 = vmor %vm804_vm14, %vm805_vm0  ;;  %vm814_vm2 = vweird.f32 %v795_v15 }
 0x477   :  { %v800_v17 = vmul.f32 %v1017_v14, %v799_v16 }
 0x479   :  { %v801_v18 = vmul.f32 0.5, %v800_v17  ;;  %v786_v19 = vpop.xlane.xlu0 %785 }
 0x47a   :  { %v792_v20 = vmul.f32 0.007518797, %v786_v19 }
 0x47b   :  { %v802_v22 = vsub.f32 1.5, %v801_v18 }
 0x47c   :  { %v1019_v23 = vpop.eup %1018  ;;  %v796_v32 = vadd.f32 1e-06, %v792_v20 }
 0x47d   :  { %v803_v24 = vmul.f32 %v1017_v14, %v802_v22  ;;  %v809_v25 = vmul.f32 %v1019_v23, %v795_v15  ;;  %vm815_vm1 = vweird.f32 %v1019_v23 }
 0x47e   :  { %1020 = vrsqrt.f32 %v796_v32  ;;  %vm816_vm3 = vmor %vm814_vm2, %vm815_vm1  ;;  %vm824_vm5 = vweird.f32 %v796_v32 }
 0x47f   :  { %v807_v28 = vsel %vm806_vm15, %v1017_v14, %v803_v24  ;;  %v810_v34 = vmul.f32 %v1019_v23, %v809_v25 }
 0x480   :  { %v838_v30 = vmul.f32 %v807_v28, %v1376_v37  ;;  %v839_v31 = vmul.f32 %v807_v28, %v1378_v44 }
 0x481   :  { %v811_v40 = vmul.f32 0.5, %v810_v34 }
 0x482   :  { %v852_v41 = vmul.f32 %v1414_v26, %v838_v30  ;;  %v853_v42 = vmul.f32 %v1416_v27, %v839_v31 }
 0x483   :  { %v812_v36 = vsub.f32 1.5, %v811_v40 }
 0x484   :  { %v1021_v43 = vpop.eup %1020  ;;  %v866_v45 = vadd.f32 %v1418_v35, %v852_v41  ;;  %v867_v38 = vadd.f32 %v1420_v29, %v853_v42 }
 0x485   :  { %v813_v39 = vmul.f32 %v1019_v23, %v812_v36  ;;  %v819_v46 = vmul.f32 %v1021_v43, %v796_v32  ;;  %vm825_vm4 = vweird.f32 %v1021_v43 }
 0x486   :  { %874 = vst [vmem:[#allocation17] sm:$0xff] %v866_v45  ;;  %vm826_vm6 = vmor %vm824_vm5, %vm825_vm4 }
 0x487   :  { %875 = vst [vmem:[#allocation17 + $0x8] sm:$0xff] %v867_v38  ;;  %v817_v37 = vsel %vm816_vm3, %v1019_v23, %v813_v39  ;;  %v820_v44 = vmul.f32 %v1021_v43, %v819_v46  ;;  %v789_v47 = vpop.xlane.xlu1 %788 }
 0x488   :  { %v840_v48 = vmul.f32 %v817_v37, %v1384_v50  ;;  %v841_v49 = vmul.f32 %v817_v37, %v1386_v51  ;;  %v793_v52 = vmul.f32 0.007518797, %v789_v47 }
 0x489   :  { %v821_v53 = vmul.f32 0.5, %v820_v44 }
 0x48a   :  { %v854_v54 = vmul.f32 %v1414_v26, %v840_v48  ;;  %v855_v55 = vmul.f32 %v1416_v27, %v841_v49  ;;  %v797_v56 = vadd.f32 1e-06, %v793_v52 }
 0x48b   :  { %v822_v57 = vsub.f32 1.5, %v821_v53 }
 0x48c   :  { %v868_v58 = vadd.f32 %v1418_v35, %v854_v54  ;;  %v869_v61 = vadd.f32 %v1420_v29, %v855_v55  ;;  %1022 = vrsqrt.f32 %v797_v56  ;;  %vm834_vm8 = vweird.f32 %v797_v56 }
 0x48d   :  { %v823_v62 = vmul.f32 %v1021_v43, %v822_v57 }
 0x48e   :  { %876 = vst [vmem:[#allocation17 + $0x10] sm:$0xff] %v868_v58 }
 0x48f   :  { %877 = vst [vmem:[#allocation17 + $0x18] sm:$0xff] %v869_v61  ;;  %v827_v50 = vsel %vm826_vm6, %v1021_v43, %v823_v62 }
 0x490   :  { %v842_v51 = vmul.f32 %v827_v50, %v1392_v59  ;;  %v843_v63 = vmul.f32 %v827_v50, %v1394_v60 }
 0x492   :  { %v1023_v0 = vpop.eup %1022  ;;  %v856_v1 = vmul.f32 %v1414_v26, %v842_v51  ;;  %v857_v2 = vmul.f32 %v1416_v27, %v843_v63 }
 0x493   :  { %v829_v3 = vmul.f32 %v1023_v0, %v797_v56  ;;  %vm835_vm7 = vweird.f32 %v1023_v0 }
 0x494   :  { %v870_v6 = vadd.f32 %v1418_v35, %v856_v1  ;;  %v871_v7 = vadd.f32 %v1420_v29, %v857_v2  ;;  %vm836_vm9 = vmor %vm834_vm8, %vm835_vm7 }
 0x495   :  { %v830_v8 = vmul.f32 %v1023_v0, %v829_v3 }
 0x496   :  { %878 = vst [vmem:[#allocation17 + $0x20] sm:$0xff] %v870_v6 }
 0x497   :  { %879 = vst [vmem:[#allocation17 + $0x28] sm:$0xff] %v871_v7  ;;  %v831_v9 = vmul.f32 0.5, %v830_v8 }
 0x499   :  { %v832_v10 = vsub.f32 1.5, %v831_v9 }
 0x49b   :  { %v833_v11 = vmul.f32 %v1023_v0, %v832_v10 }
 0x49d   :  { %v837_v59 = vsel %vm836_vm9, %v1023_v0, %v833_v11 }
 0x49e   :  { %v844_v60 = vmul.f32 %v837_v59, %v1400_v4  ;;  %v845_v12 = vmul.f32 %v837_v59, %v1402_v5 }
 0x4a0   :  { %v858_v13 = vmul.f32 %v1414_v26, %v844_v60  ;;  %v859_v14 = vmul.f32 %v1416_v27, %v845_v12 }
 0x4a2   :  { %v872_v15 = vadd.f32 %v1418_v35, %v858_v13  ;;  %v873_v16 = vadd.f32 %v1420_v29, %v859_v14 }
 0x4a4   :  { %880 = vst [vmem:[#allocation17 + $0x30] sm:$0xff] %v872_v15 }
 0x4a5   :  { %881 = vst [vmem:[#allocation17 + $0x38] sm:$0xff] %v873_v16 }
 0x4a6   :  { %894 = dma.vmem_to_hbm [thread:$0]  %s887_s7, 1024, %s889_s11, [#allocation8], %s1203_s21, %s1203_s21, %s1204_s22  }
 0x4a7   :  { %1200 = dma.done.wait [#allocation8], 1024  }
 0x4a8   :  { %1201 = vsyncadd [#allocation8], 4294966272 }
 0x4a9   :  { %899 = vsyncpa [#allocation7], 1 }
 0x4aa   :  { %900 = vsyncpa [#allocation10], 1 }
 0x4ab   :  { %901 = vsyncpa [#allocation13], 1 }
 0x4ac   :  { %902 = vsyncpa [#allocation16], 1 }
 0x4ad   :  { %903 = vsyncpa [#allocation8], 1 }

</bundles_post_ra>
